<compile_context>
chip_gen: v7x
topology: tpu7x:2x2x1
jax: 0.10.0
libtpu: 0.0.40
codegen_flags: <defaults>
</compile_context>

<pallas_src>
import functools

import jax
import jax.numpy as jnp
from jax.experimental import pallas as pl
from jax.experimental.pallas import tpu as pltpu


def _round_up(x, m):
    return (x + m - 1) // m * m


def _cdiv(a, b):
    return (a + b - 1) // b


def _triplet_mlp_kernel(a_ref, p_ref, n_ref,
                        w1_ref, b1_ref, w2_ref, b2_ref, w3_ref, b3_ref,
                        oa_ref, op_ref, on_ref):
    # Resident (constant index_map) weights/biases: load once per grid step.
    w1 = w1_ref[...]
    b1 = b1_ref[...]
    w2 = w2_ref[...]
    b2 = b2_ref[...]
    w3 = w3_ref[...]
    b3 = b3_ref[...]

    def mlp(x_ref, o_ref):
        # f32 tile straight from HBM; cast to bf16 in-kernel for the MXU.
        x = x_ref[...].astype(jnp.bfloat16)

        # Layer 1: Linear + ReLU   (Dropout(0.5) -> identity in eval mode)
        h1 = jnp.dot(x, w1, preferred_element_type=jnp.float32) + b1
        h1 = jnp.maximum(h1, 0.0).astype(jnp.bfloat16)   # narrow for spills

        # Layer 2: Linear + ReLU   (Dropout(0.5) -> identity in eval mode)
        h2 = jnp.dot(h1, w2, preferred_element_type=jnp.float32) + b2
        h2 = jnp.maximum(h2, 0.0).astype(jnp.bfloat16)

        # Layer 3: Linear
        out = jnp.dot(h2, w3, preferred_element_type=jnp.float32) + b3
        o_ref[...] = out.astype(o_ref.dtype)

    mlp(a_ref, oa_ref)
    mlp(p_ref, op_ref)
    mlp(n_ref, on_ref)


def _pad_params(params):
    """Zero-pad every lane dim to a multiple of 128; weights bf16, biases f32.

    Padding is exact: padded bias entries are 0, ReLU(0) = 0, and padded
    weight rows only ever multiply those zero activations."""
    w1, b1, w2, b2, w3, b3 = params
    D, H1 = w1.shape
    H2, O = w2.shape[1], w3.shape[1]
    H1p, H2p, Op = _round_up(H1, 128), _round_up(H2, 128), _round_up(O, 128)

    w1p = jnp.pad(w1, ((0, 0), (0, H1p - H1))).astype(jnp.bfloat16)
    b1p = jnp.pad(b1, ((0, 0), (0, H1p - H1))).astype(jnp.float32)
    w2p = jnp.pad(w2, ((0, H1p - H1), (0, H2p - H2))).astype(jnp.bfloat16)
    b2p = jnp.pad(b2, ((0, 0), (0, H2p - H2))).astype(jnp.float32)
    w3p = jnp.pad(w3, ((0, H2p - H2), (0, Op - O))).astype(jnp.bfloat16)
    b3p = jnp.pad(b3, ((0, 0), (0, Op - O))).astype(jnp.float32)
    return (w1p, b1p, w2p, b2p, w3p, b3p), O


@functools.partial(jax.jit, static_argnames=("tile_m",))
def _triplet_forward_jit(anchor, positive, negative, params, *, tile_m=512):
    (w1, b1, w2, b2, w3, b3), out_dim = _pad_params(params)
    B, D = anchor.shape
    H1p, H2p, Op = w1.shape[1], w2.shape[1], w3.shape[1]

    # Row tiling: pick tm so per-tile padding is <= 15 rows; rows stay
    # sublane-aligned (multiple of 16).
    n_tiles = _cdiv(B, tile_m)
    tm = _round_up(_cdiv(B, n_tiles), 16)
    M = n_tiles * tm

    def pad_rows(x):
        return x if M == B else jnp.pad(x, ((0, M - B), (0, 0)))

    anchor = pad_rows(anchor)
    positive = pad_rows(positive)
    negative = pad_rows(negative)

    x_spec = pl.BlockSpec((tm, D), lambda i: (i, 0))
    resident = lambda i: (0, 0)
    out_spec = pl.BlockSpec((tm, Op), lambda i: (i, 0))

    oa, op_, on = pl.pallas_call(
        _triplet_mlp_kernel,
        out_shape=tuple(jax.ShapeDtypeStruct((M, Op), jnp.float32)
                        for _ in range(3)),
        grid_spec=pltpu.PrefetchScalarGridSpec(
            num_scalar_prefetch=0,
            grid=(n_tiles,),
            in_specs=[
                x_spec, x_spec, x_spec,                  # anchor / positive / negative
                pl.BlockSpec((D, H1p), resident),        # w1 (resident)
                pl.BlockSpec((1, H1p), resident),        # b1
                pl.BlockSpec((H1p, H2p), resident),      # w2
                pl.BlockSpec((1, H2p), resident),        # b2
                pl.BlockSpec((H2p, Op), resident),       # w3
                pl.BlockSpec((1, Op), resident),         # b3
            ],
            out_specs=(out_spec, out_spec, out_spec),
        ),
        compiler_params=pltpu.CompilerParams(
            dimension_semantics=("parallel",),
            vmem_limit_bytes=64 * 1024 * 1024,
        ),
    )(anchor, positive, negative, w1, b1, w2, b2, w3, b3)

    # Strip row padding and the lane padding of the final layer.
    return oa[:B, :out_dim], op_[:B, :out_dim], on[:B, :out_dim]


def triplet_mlp_forward(anchor, positive, negative, params, *, tile_m=512):
    """TripletResNet_features.forward: same MLP applied to all three inputs.

    On v5e/v6e (128 MiB VMEM) tile_m=1024 is a good choice for large batches;
    tile_m=512 is safe on every generation (incl. v7x's 64 MiB VMEM)."""
    return _triplet_forward_jit(anchor, positive, negative, params,
                                tile_m=tile_m)


def init_params(key, input_size):
    """Deterministic init mimicking PyTorch nn.Linear default
    (U[-1/sqrt(fan_in), 1/sqrt(fan_in)]).  Weights stored transposed:
    (in_features, out_features); biases as (1, out_features)."""
    h1 = input_size // 2
    h2 = h1 // 2
    out = h2 // 2
    dims = [(input_size, h1), (h1, h2), (h2, out)]
    params = []
    for i, (fan_in, fan_out) in enumerate(dims):
        kw, kb = jax.random.split(jax.random.fold_in(key, i))
        bound = 1.0 / jnp.sqrt(float(fan_in))
        w = jax.random.uniform(kw, (fan_in, fan_out), jnp.float32, -bound, bound)
        b = jax.random.uniform(kb, (1, fan_out), jnp.float32, -bound, bound)
        params += [w, b]
    return tuple(params)


def reference_forward(anchor, positive, negative, params, *, emulate_bf16=False):
    w1, b1, w2, b2, w3, b3 = params
    if emulate_bf16:
        q = lambda a: a.astype(jnp.bfloat16).astype(jnp.float32)
        w1, w2, w3 = q(w1), q(w2), q(w3)
    else:
        q = lambda a: a

    def f(x):
        h = jnp.maximum(q(x) @ w1 + b1, 0.0)
        h = jnp.maximum(q(h) @ w2 + b2, 0.0)
        return q(h) @ w3 + b3

    return f(anchor), f(positive), f(negative)


if __name__ == "__main__":
    key = jax.random.PRNGKey(0)
    B = 8
    INPUT_SIZE = 256  # -> hidden 128, 64, output 32

    k_a, k_p, k_n, k_w = jax.random.split(key, 4)
    anchor = jax.random.normal(k_a, (B, INPUT_SIZE), jnp.float32)
    positive = jax.random.normal(k_p, (B, INPUT_SIZE), jnp.float32)
    negative = jax.random.normal(k_n, (B, INPUT_SIZE), jnp.float32)

    params = init_params(k_w, INPUT_SIZE)

    a_out, p_out, n_out = triplet_mlp_forward(anchor, positive, negative, params)
    jax.block_until_ready((a_out, p_out, n_out))

    assert a_out.shape == (B, INPUT_SIZE // 8)
    assert p_out.shape == (B, INPUT_SIZE // 8)
    assert n_out.shape == (B, INPUT_SIZE // 8)

    # Tight-ish check vs. a bf16-quantized reference (same quantization as the
    # kernel's MXU inputs), plus a looser check vs. the pure-f32 reference.
    a_bq, p_bq, n_bq = reference_forward(anchor, positive, negative, params,
                                         emulate_bf16=True)
    assert jnp.allclose(a_out, a_bq, atol=1e-2, rtol=1e-2)
    assert jnp.allclose(p_out, p_bq, atol=1e-2, rtol=1e-2)
    assert jnp.allclose(n_out, n_bq, atol=1e-2, rtol=1e-2)

    a_ref, p_ref, n_ref = reference_forward(anchor, positive, negative, params)
    assert jnp.allclose(a_out, a_ref, atol=3e-2, rtol=3e-2)
    assert jnp.allclose(p_out, p_ref, atol=3e-2, rtol=3e-2)
    assert jnp.allclose(n_out, n_ref, atol=3e-2, rtol=3e-2)

    print("KERNEL_OK")
</pallas_src>

<mosaic_0001>
module attributes {stable_mosaic.version = 11 : i64} {
  func.func @_triplet_mlp_kernel(%arg0: i32, %arg1: memref<16x256xf32, #tpu.memory_space<vmem>>, %arg2: memref<16x256xf32, #tpu.memory_space<vmem>>, %arg3: memref<16x256xf32, #tpu.memory_space<vmem>>, %arg4: memref<256x128xbf16, #tpu.memory_space<vmem>>, %arg5: memref<1x128xf32, #tpu.memory_space<vmem>>, %arg6: memref<128x128xbf16, #tpu.memory_space<vmem>>, %arg7: memref<1x128xf32, #tpu.memory_space<vmem>>, %arg8: memref<128x128xbf16, #tpu.memory_space<vmem>>, %arg9: memref<1x128xf32, #tpu.memory_space<vmem>>, %arg10: memref<16x128xf32, #tpu.memory_space<vmem>>, %arg11: memref<16x128xf32, #tpu.memory_space<vmem>>, %arg12: memref<16x128xf32, #tpu.memory_space<vmem>>) attributes {dimension_semantics = [#tpu.dimension_semantics<parallel>], iteration_bounds = array<i64: 1>, scalar_prefetch = 0 : i64, scratch_operands = 0 : i64, tpu.core_type = #tpu.core_type<tc>, window_params = [{transform_indices = @transform_0, window_bounds = array<i64: 16, 256>}, {transform_indices = @transform_1, window_bounds = array<i64: 16, 256>}, {transform_indices = @transform_2, window_bounds = array<i64: 16, 256>}, {pipeline_mode = #tpu.pipeline_mode<synchronous>, transform_indices = @transform_3, window_bounds = array<i64: 256, 128>}, {pipeline_mode = #tpu.pipeline_mode<synchronous>, transform_indices = @transform_4, window_bounds = array<i64: 1, 128>}, {pipeline_mode = #tpu.pipeline_mode<synchronous>, transform_indices = @transform_5, window_bounds = array<i64: 128, 128>}, {pipeline_mode = #tpu.pipeline_mode<synchronous>, transform_indices = @transform_6, window_bounds = array<i64: 1, 128>}, {pipeline_mode = #tpu.pipeline_mode<synchronous>, transform_indices = @transform_7, window_bounds = array<i64: 128, 128>}, {pipeline_mode = #tpu.pipeline_mode<synchronous>, transform_indices = @transform_8, window_bounds = array<i64: 1, 128>}, {transform_indices = @transform_9, window_bounds = array<i64: 16, 128>}, {transform_indices = @transform_10, window_bounds = array<i64: 16, 128>}, {transform_indices = @transform_11, window_bounds = array<i64: 16, 128>}]} {
    %c0 = arith.constant 0 : index
    %c0_0 = arith.constant 0 : index
    %0 = vector.load %arg4[%c0, %c0_0] : memref<256x128xbf16, #tpu.memory_space<vmem>>, vector<256x128xbf16>
    %c0_1 = arith.constant 0 : index
    %c0_2 = arith.constant 0 : index
    %1 = vector.load %arg5[%c0_1, %c0_2] : memref<1x128xf32, #tpu.memory_space<vmem>>, vector<1x128xf32>
    %c0_3 = arith.constant 0 : index
    %c0_4 = arith.constant 0 : index
    %2 = vector.load %arg6[%c0_3, %c0_4] : memref<128x128xbf16, #tpu.memory_space<vmem>>, vector<128x128xbf16>
    %c0_5 = arith.constant 0 : index
    %c0_6 = arith.constant 0 : index
    %3 = vector.load %arg7[%c0_5, %c0_6] : memref<1x128xf32, #tpu.memory_space<vmem>>, vector<1x128xf32>
    %c0_7 = arith.constant 0 : index
    %c0_8 = arith.constant 0 : index
    %4 = vector.load %arg8[%c0_7, %c0_8] : memref<128x128xbf16, #tpu.memory_space<vmem>>, vector<128x128xbf16>
    %c0_9 = arith.constant 0 : index
    %c0_10 = arith.constant 0 : index
    %5 = vector.load %arg9[%c0_9, %c0_10] : memref<1x128xf32, #tpu.memory_space<vmem>>, vector<1x128xf32>
    %c0_11 = arith.constant 0 : index
    %c0_12 = arith.constant 0 : index
    %6 = vector.load %arg1[%c0_11, %c0_12] : memref<16x256xf32, #tpu.memory_space<vmem>>, vector<16x256xf32>
    %7 = arith.truncf %6 : vector<16x256xf32> to vector<16x256xbf16>
    %cst = arith.constant dense<0.000000e+00> : vector<16x128xf32>
    %8 = tpu.matmul %7, %0, %cst {dimension_numbers = #tpu.dot_dimension_numbers<[1], [0], [0], [1], [0, 0, 1, 1], [], []>} : vector<16x256xbf16>, vector<256x128xbf16>, vector<16x128xf32> -> vector<16x128xf32>
    %9 = vector.broadcast %1 : vector<1x128xf32> to vector<16x128xf32>
    %10 = arith.addf %8, %9 : vector<16x128xf32>
    %cst_13 = arith.constant 0.000000e+00 : f32
    %11 = vector.broadcast %cst_13 : f32 to vector<16x128xf32>
    %12 = arith.maximumf %10, %11 : vector<16x128xf32>
    %13 = arith.truncf %12 : vector<16x128xf32> to vector<16x128xbf16>
    %cst_14 = arith.constant dense<0.000000e+00> : vector<16x128xf32>
    %14 = tpu.matmul %13, %2, %cst_14 {dimension_numbers = #tpu.dot_dimension_numbers<[1], [0], [0], [1], [0, 0, 1, 1], [], []>} : vector<16x128xbf16>, vector<128x128xbf16>, vector<16x128xf32> -> vector<16x128xf32>
    %15 = vector.broadcast %3 : vector<1x128xf32> to vector<16x128xf32>
    %16 = arith.addf %14, %15 : vector<16x128xf32>
    %cst_15 = arith.constant 0.000000e+00 : f32
    %17 = vector.broadcast %cst_15 : f32 to vector<16x128xf32>
    %18 = arith.maximumf %16, %17 : vector<16x128xf32>
    %19 = arith.truncf %18 : vector<16x128xf32> to vector<16x128xbf16>
    %cst_16 = arith.constant dense<0.000000e+00> : vector<16x128xf32>
    %20 = tpu.matmul %19, %4, %cst_16 {dimension_numbers = #tpu.dot_dimension_numbers<[1], [0], [0], [1], [0, 0, 1, 1], [], []>} : vector<16x128xbf16>, vector<128x128xbf16>, vector<16x128xf32> -> vector<16x128xf32>
    %21 = vector.broadcast %5 : vector<1x128xf32> to vector<16x128xf32>
    %22 = arith.addf %20, %21 : vector<16x128xf32>
    %c0_17 = arith.constant 0 : index
    %c0_18 = arith.constant 0 : index
    %23 = vector.load %arg10[%c0_17, %c0_18] : memref<16x128xf32, #tpu.memory_space<vmem>>, vector<16x128xf32>
    tpu.vector_store %arg10[%c0_17, %c0_18], %22 {strides = array<i32>} : memref<16x128xf32, #tpu.memory_space<vmem>>, vector<16x128xf32>,
    %c0_19 = arith.constant 0 : index
    %c0_20 = arith.constant 0 : index
    %24 = vector.load %arg2[%c0_19, %c0_20] : memref<16x256xf32, #tpu.memory_space<vmem>>, vector<16x256xf32>
    %25 = arith.truncf %24 : vector<16x256xf32> to vector<16x256xbf16>
    %cst_21 = arith.constant dense<0.000000e+00> : vector<16x128xf32>
    %26 = tpu.matmul %25, %0, %cst_21 {dimension_numbers = #tpu.dot_dimension_numbers<[1], [0], [0], [1], [0, 0, 1, 1], [], []>} : vector<16x256xbf16>, vector<256x128xbf16>, vector<16x128xf32> -> vector<16x128xf32>
    %27 = vector.broadcast %1 : vector<1x128xf32> to vector<16x128xf32>
    %28 = arith.addf %26, %27 : vector<16x128xf32>
    %cst_22 = arith.constant 0.000000e+00 : f32
    %29 = vector.broadcast %cst_22 : f32 to vector<16x128xf32>
    %30 = arith.maximumf %28, %29 : vector<16x128xf32>
    %31 = arith.truncf %30 : vector<16x128xf32> to vector<16x128xbf16>
    %cst_23 = arith.constant dense<0.000000e+00> : vector<16x128xf32>
    %32 = tpu.matmul %31, %2, %cst_23 {dimension_numbers = #tpu.dot_dimension_numbers<[1], [0], [0], [1], [0, 0, 1, 1], [], []>} : vector<16x128xbf16>, vector<128x128xbf16>, vector<16x128xf32> -> vector<16x128xf32>
    %33 = vector.broadcast %3 : vector<1x128xf32> to vector<16x128xf32>
    %34 = arith.addf %32, %33 : vector<16x128xf32>
    %cst_24 = arith.constant 0.000000e+00 : f32
    %35 = vector.broadcast %cst_24 : f32 to vector<16x128xf32>
    %36 = arith.maximumf %34, %35 : vector<16x128xf32>
    %37 = arith.truncf %36 : vector<16x128xf32> to vector<16x128xbf16>
    %cst_25 = arith.constant dense<0.000000e+00> : vector<16x128xf32>
    %38 = tpu.matmul %37, %4, %cst_25 {dimension_numbers = #tpu.dot_dimension_numbers<[1], [0], [0], [1], [0, 0, 1, 1], [], []>} : vector<16x128xbf16>, vector<128x128xbf16>, vector<16x128xf32> -> vector<16x128xf32>
    %39 = vector.broadcast %5 : vector<1x128xf32> to vector<16x128xf32>
    %40 = arith.addf %38, %39 : vector<16x128xf32>
    %c0_26 = arith.constant 0 : index
    %c0_27 = arith.constant 0 : index
    %41 = vector.load %arg11[%c0_26, %c0_27] : memref<16x128xf32, #tpu.memory_space<vmem>>, vector<16x128xf32>
    tpu.vector_store %arg11[%c0_26, %c0_27], %40 {strides = array<i32>} : memref<16x128xf32, #tpu.memory_space<vmem>>, vector<16x128xf32>,
    %c0_28 = arith.constant 0 : index
    %c0_29 = arith.constant 0 : index
    %42 = vector.load %arg3[%c0_28, %c0_29] : memref<16x256xf32, #tpu.memory_space<vmem>>, vector<16x256xf32>
    %43 = arith.truncf %42 : vector<16x256xf32> to vector<16x256xbf16>
    %cst_30 = arith.constant dense<0.000000e+00> : vector<16x128xf32>
    %44 = tpu.matmul %43, %0, %cst_30 {dimension_numbers = #tpu.dot_dimension_numbers<[1], [0], [0], [1], [0, 0, 1, 1], [], []>} : vector<16x256xbf16>, vector<256x128xbf16>, vector<16x128xf32> -> vector<16x128xf32>
    %45 = vector.broadcast %1 : vector<1x128xf32> to vector<16x128xf32>
    %46 = arith.addf %44, %45 : vector<16x128xf32>
    %cst_31 = arith.constant 0.000000e+00 : f32
    %47 = vector.broadcast %cst_31 : f32 to vector<16x128xf32>
    %48 = arith.maximumf %46, %47 : vector<16x128xf32>
    %49 = arith.truncf %48 : vector<16x128xf32> to vector<16x128xbf16>
    %cst_32 = arith.constant dense<0.000000e+00> : vector<16x128xf32>
    %50 = tpu.matmul %49, %2, %cst_32 {dimension_numbers = #tpu.dot_dimension_numbers<[1], [0], [0], [1], [0, 0, 1, 1], [], []>} : vector<16x128xbf16>, vector<128x128xbf16>, vector<16x128xf32> -> vector<16x128xf32>
    %51 = vector.broadcast %3 : vector<1x128xf32> to vector<16x128xf32>
    %52 = arith.addf %50, %51 : vector<16x128xf32>
    %cst_33 = arith.constant 0.000000e+00 : f32
    %53 = vector.broadcast %cst_33 : f32 to vector<16x128xf32>
    %54 = arith.maximumf %52, %53 : vector<16x128xf32>
    %55 = arith.truncf %54 : vector<16x128xf32> to vector<16x128xbf16>
    %cst_34 = arith.constant dense<0.000000e+00> : vector<16x128xf32>
    %56 = tpu.matmul %55, %4, %cst_34 {dimension_numbers = #tpu.dot_dimension_numbers<[1], [0], [0], [1], [0, 0, 1, 1], [], []>} : vector<16x128xbf16>, vector<128x128xbf16>, vector<16x128xf32> -> vector<16x128xf32>
    %57 = vector.broadcast %5 : vector<1x128xf32> to vector<16x128xf32>
    %58 = arith.addf %56, %57 : vector<16x128xf32>
    %c0_35 = arith.constant 0 : index
    %c0_36 = arith.constant 0 : index
    %59 = vector.load %arg12[%c0_35, %c0_36] : memref<16x128xf32, #tpu.memory_space<vmem>>, vector<16x128xf32>
    tpu.vector_store %arg12[%c0_35, %c0_36], %58 {strides = array<i32>} : memref<16x128xf32, #tpu.memory_space<vmem>>, vector<16x128xf32>,
    return
  }
  func.func @transform_0(%arg0: i32) -> (i32, i32) {
    %c0_i32 = arith.constant 0 : i32
    %c0_i32_0 = arith.constant 0 : i32
    return %arg0, %c0_i32 : i32, i32
  }
  func.func @transform_1(%arg0: i32) -> (i32, i32) {
    %c0_i32 = arith.constant 0 : i32
    %c0_i32_0 = arith.constant 0 : i32
    return %arg0, %c0_i32 : i32, i32
  }
  func.func @transform_2(%arg0: i32) -> (i32, i32) {
    %c0_i32 = arith.constant 0 : i32
    %c0_i32_0 = arith.constant 0 : i32
    return %arg0, %c0_i32 : i32, i32
  }
  func.func @transform_3(%arg0: i32) -> (i32, i32) {
    %c0_i32 = arith.constant 0 : i32
    %c0_i32_0 = arith.constant 0 : i32
    %c0_i32_1 = arith.constant 0 : i32
    return %c0_i32, %c0_i32_0 : i32, i32
  }
  func.func @transform_4(%arg0: i32) -> (i32, i32) {
    %c0_i32 = arith.constant 0 : i32
    %c0_i32_0 = arith.constant 0 : i32
    %c0_i32_1 = arith.constant 0 : i32
    return %c0_i32, %c0_i32_0 : i32, i32
  }
  func.func @transform_5(%arg0: i32) -> (i32, i32) {
    %c0_i32 = arith.constant 0 : i32
    %c0_i32_0 = arith.constant 0 : i32
    %c0_i32_1 = arith.constant 0 : i32
    return %c0_i32, %c0_i32_0 : i32, i32
  }
  func.func @transform_6(%arg0: i32) -> (i32, i32) {
    %c0_i32 = arith.constant 0 : i32
    %c0_i32_0 = arith.constant 0 : i32
    %c0_i32_1 = arith.constant 0 : i32
    return %c0_i32, %c0_i32_0 : i32, i32
  }
  func.func @transform_7(%arg0: i32) -> (i32, i32) {
    %c0_i32 = arith.constant 0 : i32
    %c0_i32_0 = arith.constant 0 : i32
    %c0_i32_1 = arith.constant 0 : i32
    return %c0_i32, %c0_i32_0 : i32, i32
  }
  func.func @transform_8(%arg0: i32) -> (i32, i32) {
    %c0_i32 = arith.constant 0 : i32
    %c0_i32_0 = arith.constant 0 : i32
    %c0_i32_1 = arith.constant 0 : i32
    return %c0_i32, %c0_i32_0 : i32, i32
  }
  func.func @transform_9(%arg0: i32) -> (i32, i32) {
    %c0_i32 = arith.constant 0 : i32
    %c0_i32_0 = arith.constant 0 : i32
    return %arg0, %c0_i32 : i32, i32
  }
  func.func @transform_10(%arg0: i32) -> (i32, i32) {
    %c0_i32 = arith.constant 0 : i32
    %c0_i32_0 = arith.constant 0 : i32
    return %arg0, %c0_i32 : i32, i32
  }
  func.func @transform_11(%arg0: i32) -> (i32, i32) {
    %c0_i32 = arith.constant 0 : i32
    %c0_i32_0 = arith.constant 0 : i32
    return %arg0, %c0_i32 : i32, i32
  }
}

</mosaic_0001>

<bundles_post_ra>
// kernel: _triplet_forward_jit.1
= control target key start
LH: loop header
LB: loop body
LE: loop exit
PB: predicated region body
PF: predicated region fallthrough
CT: control target
= control target key end

     0   :  { %17 = vsyncpa [#allocation3], 0  ;;  %s2015_s0 = inlined_call_operand.hbm [shape: f32[16,256], index: 0, kind: input, shape index: {}]   ;;  %s2016_s1 = inlined_call_operand.hbm [shape: f32[16,256], index: 1, kind: input, shape index: {}]   ;;  %s2017_s2 = inlined_call_operand.hbm [shape: f32[16,256], index: 2, kind: input, shape index: {}]   ;;  %s2018_s3 = inlined_call_operand.hbm [shape: bf16[256,128], index: 3, kind: input, shape index: {}]   ;;  %s2019_s4 = inlined_call_operand.hbm [shape: f32[1,128], index: 4, kind: input, shape index: {}]   ;;  %s2020_s5 = inlined_call_operand.hbm [shape: bf16[128,128], index: 5, kind: input, shape index: {}]   ;;  %s2021_s6 = inlined_call_operand.hbm [shape: f32[1,128], index: 6, kind: input, shape index: {}]   ;;  %s2022_s7 = inlined_call_operand.hbm [shape: bf16[128,128], index: 7, kind: input, shape index: {}]   ;;  %s2023_s8 = inlined_call_operand.hbm [shape: f32[1,128], index: 8, kind: input, shape index: {}]   ;;  %s2024_s9 = inlined_call_operand.hbm [shape: f32[16,128], index: 9, kind: output, shape index: {0}]   ;;  %s2025_s10 = inlined_call_operand.hbm [shape: f32[16,128], index: 10, kind: output, shape index: {1}]   ;;  %s2026_s11 = inlined_call_operand.hbm [shape: f32[16,128], index: 11, kind: output, shape index: {2}]  }
   0x1   :  { %18 = vsyncpa [#allocation6], 0 }
   0x2   :  { %19 = vsyncpa [#allocation9], 0 }
   0x3   :  { %20 = vsyncpa [#allocation12], 0 }
   0x4   :  { %21 = vsyncpa [#allocation15], 0 }
   0x5   :  { %22 = vsyncpa [#allocation4], 0 }
   0x6   :  { %23 = vsyncpa [#allocation19], 0  ;;  %s1499_s17 = smov [#allocation5]   ;;  %s1500_s19 = smov [#allocation8]  }
   0x7   :  { %s41_s18 = sshll.u32 %s1499_s17, 4  ;;  %s65_s20 = sshll.u32 %s1500_s19, 4  ;;  %s42_s18 = int_to_ptr.vmem [resolvable:$true] %s41_s18  ;;  %s1579_s20 = int_to_ptr.vmem [resolvable:$true] %s65_s20 }
   0x8   :  { %s1221_s23 = scalar_lea.hbm %s2016_s1, 512 }
   0x9   :  { %p1222_p0 = scmp.ne.s32.totalorder %s2016_s1, %s1221_s23  ;;  %p1225_p1 = scmp.lt.u32.totalorder %s1221_s23, %s2016_s1 }
   0xb   :  { %p1227_p2 = pnand %p1225_p1, %p1222_p0 }
   0xd   :  { %1230 = shalt.err (!%p1227_p2)
}
   0xe   :  { %s1231_s28 = scalar_lea.vmem %s42_s18, 512  ;;  %p1236_p4 = scmp.lt.s32.totalorder %s42_s18, %s42_s18 }
   0xf   :  { %p1232_p3 = scmp.ne.s32.totalorder %s42_s18, %s1231_s28  ;;  %p1237_p5 = scmp.lt.s32.totalorder %s1231_s28, %s1231_s28 }
  0x11   :  { %p1238_p6 = por %p1237_p5, %p1236_p4 }
  0x13   :  { %p1239_p7 = pnand %p1238_p6, %p1232_p3 }
  0x15   :  { %1242 = shalt.err (!%p1239_p7)
}
  0x16   :  { %s1501_s29 = smov 256   ;;  %s1502_s30 = smov 16  }
  0x17   :  { %47 = dma.hbm_to_vmem [thread:$0]  %s2016_s1, 512, %s42_s18, [#allocation6], %s1501_s29, %s1501_s29, %s1502_s30  }
  0x18   :  { %s1243_s16 = scalar_lea.hbm %s2018_s3, 2048 }
  0x19   :  { %p1244_p8 = scmp.ne.s32.totalorder %s2018_s3, %s1243_s16  ;;  %p1247_p9 = scmp.lt.u32.totalorder %s1243_s16, %s2018_s3 }
  0x1b   :  { %p1249_p10 = pnand %p1247_p9, %p1244_p8 }
  0x1d   :  { %1252 = shalt.err (!%p1249_p10)
}
  0x1e   :  { %s1253_s23 = scalar_lea.vmem %s1579_s20, 2048  ;;  %p1258_p12 = scmp.lt.s32.totalorder %s1579_s20, %s1579_s20 }
  0x1f   :  { %p1254_p11 = scmp.ne.s32.totalorder %s1579_s20, %s1253_s23  ;;  %p1259_p13 = scmp.lt.s32.totalorder %s1253_s23, %s1253_s23 }
  0x21   :  { %p1260_p0 = por %p1259_p13, %p1258_p12 }
  0x23   :  { %p1261_p1 = pnand %p1260_p0, %p1254_p11 }
  0x25   :  { %1264 = shalt.err (!%p1261_p1)
}
  0x26   :  { %s1503_s1 = smov 64   ;;  %s1504_s18 = smov 4  }
  0x27   :  { %71 = dma.hbm_to_vmem [thread:$0]  %s2018_s3, 2048, %s1579_s20, [#allocation9], %s1503_s1, %s1503_s1, %s1504_s18  }
  0x28   :  { %s1505_s26 = smov [#allocation11]   ;;  %s1506_s28 = smov [#allocation14]  }
  0x29   :  { %s87_s27 = sshll.u32 %s1505_s26, 4  ;;  %s109_s12 = sshll.u32 %s1506_s28, 4  ;;  %s88_s27 = int_to_ptr.vmem [resolvable:$true] %s87_s27  ;;  %s1616_s12 = int_to_ptr.vmem [resolvable:$true] %s109_s12 }
  0x2a   :  { %s1265_s15 = scalar_lea.hbm %s2020_s5, 1024 }
  0x2b   :  { %p1266_p2 = scmp.ne.s32.totalorder %s2020_s5, %s1265_s15  ;;  %p1269_p3 = scmp.lt.u32.totalorder %s1265_s15, %s2020_s5 }
  0x2d   :  { %p1271_p4 = pnand %p1269_p3, %p1266_p2 }
  0x2f   :  { %1274 = shalt.err (!%p1271_p4)
}
  0x30   :  { %s1275_s3 = scalar_lea.vmem %s88_s27, 1024  ;;  %p1280_p6 = scmp.lt.s32.totalorder %s88_s27, %s88_s27 }
  0x31   :  { %p1276_p5 = scmp.ne.s32.totalorder %s88_s27, %s1275_s3  ;;  %p1281_p7 = scmp.lt.s32.totalorder %s1275_s3, %s1275_s3 }
  0x33   :  { %p1282_p8 = por %p1281_p7, %p1280_p6 }
  0x35   :  { %p1283_p9 = pnand %p1282_p8, %p1276_p5 }
  0x37   :  { %1286 = shalt.err (!%p1283_p9)
}
  0x38   :  { %93 = dma.hbm_to_vmem [thread:$0]  %s2020_s5, 1024, %s88_s27, [#allocation12], %s1503_s1, %s1503_s1, %s1504_s18  }
  0x39   :  { %s1287_s25 = scalar_lea.hbm %s2022_s7, 1024 }
  0x3a   :  { %p1288_p10 = scmp.ne.s32.totalorder %s2022_s7, %s1287_s25  ;;  %p1291_p11 = scmp.lt.u32.totalorder %s1287_s25, %s2022_s7 }
  0x3c   :  { %p1293_p12 = pnand %p1291_p11, %p1288_p10 }
  0x3e   :  { %1296 = shalt.err (!%p1293_p12)
}
  0x3f   :  { %s1297_s15 = scalar_lea.vmem %s1616_s12, 1024  ;;  %p1302_p0 = scmp.lt.s32.totalorder %s1616_s12, %s1616_s12 }
  0x40   :  { %p1298_p13 = scmp.ne.s32.totalorder %s1616_s12, %s1297_s15  ;;  %p1303_p1 = scmp.lt.s32.totalorder %s1297_s15, %s1297_s15 }
  0x42   :  { %p1304_p2 = por %p1303_p1, %p1302_p0 }
  0x44   :  { %p1305_p3 = pnand %p1304_p2, %p1298_p13 }
  0x46   :  { %1308 = shalt.err (!%p1305_p3)
}
  0x47   :  { %115 = dma.hbm_to_vmem [thread:$0]  %s2022_s7, 1024, %s1616_s12, [#allocation15], %s1503_s1, %s1503_s1, %s1504_s18  }
  0x48   :  { %s1507_s16 = smov [#allocation2]   ;;  %s1508_s19 = smov [#allocation7]  }
  0x49   :  { %s29_s17 = sshll.u32 %s1507_s16, 4  ;;  %s53_s21 = sshll.u32 %s1508_s19, 4  ;;  %s30_s17 = int_to_ptr.vmem [resolvable:$true] %s29_s17  ;;  %s1653_s21 = int_to_ptr.vmem [resolvable:$true] %s53_s21 }
  0x4a   :  { %s1309_s22 = scalar_lea.hbm %s2015_s0, 512 }
  0x4b   :  { %p1310_p4 = scmp.ne.s32.totalorder %s2015_s0, %s1309_s22  ;;  %p1313_p5 = scmp.lt.u32.totalorder %s1309_s22, %s2015_s0 }
  0x4d   :  { %p1315_p6 = pnand %p1313_p5, %p1310_p4 }
  0x4f   :  { %1318 = shalt.err (!%p1315_p6)
}
  0x50   :  { %s1319_s7 = scalar_lea.vmem %s30_s17, 512  ;;  %p1324_p8 = scmp.lt.s32.totalorder %s30_s17, %s30_s17 }
  0x51   :  { %p1320_p7 = scmp.ne.s32.totalorder %s30_s17, %s1319_s7  ;;  %p1325_p9 = scmp.lt.s32.totalorder %s1319_s7, %s1319_s7 }
  0x53   :  { %p1326_p10 = por %p1325_p9, %p1324_p8 }
  0x55   :  { %p1327_p11 = pnand %p1326_p10, %p1320_p7 }
  0x57   :  { %1330 = shalt.err (!%p1327_p11)
}
  0x58   :  { %35 = dma.hbm_to_vmem [thread:$0]  %s2015_s0, 512, %s30_s17, [#allocation3], %s1501_s29, %s1501_s29, %s1502_s30  }
  0x59   :  { %s1331_s13 = scalar_lea.hbm %s2017_s2, 512 }
  0x5a   :  { %p1332_p12 = scmp.ne.s32.totalorder %s2017_s2, %s1331_s13  ;;  %p1335_p13 = scmp.lt.u32.totalorder %s1331_s13, %s2017_s2 }
  0x5c   :  { %p1337_p0 = pnand %p1335_p13, %p1332_p12 }
  0x5e   :  { %1340 = shalt.err (!%p1337_p0)
}
  0x5f   :  { %s1341_s16 = scalar_lea.vmem %s1653_s21, 512  ;;  %p1346_p2 = scmp.lt.s32.totalorder %s1653_s21, %s1653_s21 }
  0x60   :  { %p1342_p1 = scmp.ne.s32.totalorder %s1653_s21, %s1341_s16  ;;  %p1347_p3 = scmp.lt.s32.totalorder %s1341_s16, %s1341_s16 }
  0x62   :  { %p1348_p4 = por %p1347_p3, %p1346_p2 }
  0x64   :  { %p1349_p5 = pnand %p1348_p4, %p1342_p1 }
  0x66   :  { %1352 = shalt.err (!%p1349_p5)
}
  0x67   :  { %59 = dma.hbm_to_vmem [thread:$0]  %s2017_s2, 512, %s1653_s21, [#allocation6], %s1501_s29, %s1501_s29, %s1502_s30  }
  0x68   :  { %s1509_s19 = smov [#allocation10]   ;;  %s1510_s20 = smov [#allocation13]  }
  0x69   :  { %s78_s3 = sshll.u32 %s1509_s19, 4  ;;  %s100_s22 = sshll.u32 %s1510_s20, 4  ;;  %s79_s3 = int_to_ptr.vmem [resolvable:$true] %s78_s3  ;;  %s101_s22 = int_to_ptr.vmem [resolvable:$true] %s100_s22 }
  0x6a   :  { %s1353_s25 = scalar_lea.hbm %s2019_s4, 16 }
  0x6b   :  { %p1354_p6 = scmp.ne.s32.totalorder %s2019_s4, %s1353_s25  ;;  %p1357_p7 = scmp.lt.u32.totalorder %s1353_s25, %s2019_s4 }
  0x6d   :  { %p1359_p8 = pnand %p1357_p7, %p1354_p6 }
  0x6f   :  { %1362 = shalt.err (!%p1359_p8)
}
  0x70   :  { %s1363_s2 = scalar_lea.vmem %s79_s3, 16  ;;  %s1367_s29 = scalar_lea.vmem %s79_s3, 32 }
  0x71   :  { %p1364_p9 = scmp.ne.s32.totalorder %s79_s3, %s1363_s2  ;;  %p1368_p10 = scmp.lt.s32.totalorder %s79_s3, %s79_s3 }
  0x72   :  { %p1369_p11 = scmp.lt.s32.totalorder %s1367_s29, %s1363_s2 }
  0x74   :  { %p1370_p12 = por %p1369_p11, %p1368_p10 }
  0x76   :  { %p1371_p13 = pnand %p1370_p12, %p1364_p9 }
  0x78   :  { %1374 = shalt.err (!%p1371_p13)
}
  0x79   :  { %81 = dma.hbm_to_vmem [thread:$0]  %s2019_s4, 16, %s79_s3, [#allocation9]  }
  0x7a   :  { %s1375_s13 = scalar_lea.hbm %s2021_s6, 16 }
  0x7b   :  { %p1376_p0 = scmp.ne.s32.totalorder %s2021_s6, %s1375_s13  ;;  %p1379_p1 = scmp.lt.u32.totalorder %s1375_s13, %s2021_s6 }
  0x7d   :  { %p1381_p2 = pnand %p1379_p1, %p1376_p0 }
  0x7f   :  { %1384 = shalt.err (!%p1381_p2)
}
  0x80   :  { %s1385_s16 = scalar_lea.vmem %s101_s22, 16  ;;  %s1389_s0 = scalar_lea.vmem %s101_s22, 32 }
  0x81   :  { %p1386_p3 = scmp.ne.s32.totalorder %s101_s22, %s1385_s16  ;;  %p1390_p4 = scmp.lt.s32.totalorder %s101_s22, %s101_s22 }
  0x82   :  { %p1391_p5 = scmp.lt.s32.totalorder %s1389_s0, %s1385_s16 }
  0x84   :  { %p1392_p6 = por %p1391_p5, %p1390_p4 }
  0x86   :  { %p1393_p7 = pnand %p1392_p6, %p1386_p3 }
  0x88   :  { %1396 = shalt.err (!%p1393_p7)
}
  0x89   :  { %103 = dma.hbm_to_vmem [thread:$0]  %s2021_s6, 16, %s101_s22, [#allocation12]  }
  0x8a   :  { %s1511_s19 = smov [#allocation16]   ;;  %s1397_s24 = scalar_lea.hbm %s2023_s8, 16 }
  0x8b   :  { %s122_s3 = sshll.u32 %s1511_s19, 4  ;;  %p1398_p8 = scmp.ne.s32.totalorder %s2023_s8, %s1397_s24  ;;  %s123_s3 = int_to_ptr.vmem [resolvable:$true] %s122_s3 }
  0x8c   :  { %p1401_p9 = scmp.lt.u32.totalorder %s1397_s24, %s2023_s8 }
  0x8e   :  { %p1403_p10 = pnand %p1401_p9, %p1398_p8 }
  0x90   :  { %1406 = shalt.err (!%p1403_p10)
}
  0x91   :  { %s1407_s18 = scalar_lea.vmem %s123_s3, 16  ;;  %s1411_s6 = scalar_lea.vmem %s123_s3, 32 }
  0x92   :  { %p1408_p11 = scmp.ne.s32.totalorder %s123_s3, %s1407_s18  ;;  %p1412_p12 = scmp.lt.s32.totalorder %s123_s3, %s123_s3 }
  0x93   :  { %p1413_p13 = scmp.lt.s32.totalorder %s1411_s6, %s1407_s18 }
  0x95   :  { %p1414_p0 = por %p1413_p13, %p1412_p12 }
  0x97   :  { %p1415_p1 = pnand %p1414_p0, %p1408_p11 }
  0x99   :  { %1418 = shalt.err (!%p1415_p1)
}
  0x9a   :  { %125 = dma.hbm_to_vmem [thread:$0]  %s2023_s8, 16, %s123_s3, [#allocation15]  }
  0x9b   :  { %1485 = dma.done.wait [#allocation3], 512  }
  0x9c   :  { %1486 = vsyncadd [#allocation3], 4294966784 }
  0x9d   :  { %1487 = dma.done.wait [#allocation6], 1024  }
  0x9e   :  { %1488 = vsyncadd [#allocation6], 4294966272 }
  0x9f   :  { %1489 = dma.done.wait [#allocation9], 2064  }
  0xa0   :  { %1490 = vsyncadd [#allocation9], 4294965232 }
  0xa1   :  { %1491 = dma.done.wait [#allocation12], 1040  }
  0xa2   :  { %1492 = vsyncadd [#allocation12], 4294966256 }
  0xa3   :  { %1493 = dma.done.wait [#allocation15], 1040  }
  0xa4   :  { %1494 = vsyncadd [#allocation15], 4294966256  ;;  %v1512_v0 = vmov 0.0   ;;  %v1727_v1 = vld [vmem:[#allocation8 + $0x40] sm:$0xff]   ;;  %v1732_v3 = vld [vmem:[#allocation8 + $0x48] sm:$0xff]   ;;  %vm1513_vm0 = vmmov 0  }
  0xa5   :  { %1049 = vmatprep.subr.bf16.mxu1 %v1512_v0  ;;  %v1729_v2 = vld [vmem:[#allocation8] sm:$0xff]   ;;  %929 = vmatprep.subr.bf16.mxu0 %v1727_v1  ;;  %v1735_v4 = vld [vmem:[#allocation8 + $0x8] sm:$0xff]   ;;  %v1738_v5 = vld [vmem:[#allocation8 + $0x50] sm:$0xff]   ;;  %s1514_s8 = smov [#allocation18]   ;;  %s1515_s30 = smov [#allocation17]  }
  0xa6   :  { %930 = vmatpush3.bf16.msra.mxu0 %v1729_v2  ;;  %v1741_v6 = vld [vmem:[#allocation8 + $0x10] sm:$0xff]   ;;  %v1744_v7 = vld [vmem:[#allocation8 + $0x58] sm:$0xff]   ;;  %v1750_v9 = vld [vmem:[#allocation8 + $0x60] sm:$0xff]   ;;  %1065 = vmatprep.mubr.msk.bf16.mxu1 %vm1513_vm0, %v1512_v0  ;;  %s859_s29 = sshll.u32 %s1514_s8, 4  ;;  %s847_s21 = sshll.u32 %s1515_s30, 4  ;;  %s860_s29 = int_to_ptr.vmem [resolvable:$true] %s859_s29  ;;  %s848_s21 = int_to_ptr.vmem [resolvable:$true] %s847_s21 }
  0xa7   :  { %931 = vmatprep.subr.bf16.mxu0 %v1732_v3  ;;  %v1747_v8 = vld [vmem:[#allocation8 + $0x18] sm:$0xff]   ;;  %v1753_v10 = vld [vmem:[#allocation8 + $0x20] sm:$0xff]   ;;  %v1756_v11 = vld [vmem:[#allocation8 + $0x68] sm:$0xff]   ;;  %s1419_s12 = scalar_lea.vmem %s860_s29, 256  ;;  %p1424_p3 = scmp.lt.s32.totalorder %s860_s29, %s860_s29 }
  0xa8   :  { %v222_v12 = vld [vmem:[#allocation2 + $0x8] sm:$0xff]  ;;  %v224_v13 = vld [vmem:[#allocation2 + $0x18] sm:$0xff]  ;;  %v1763_v17 = vld [vmem:[#allocation8 + $0x70] sm:$0xff]   ;;  %p1420_p2 = scmp.ne.s32.totalorder %s860_s29, %s1419_s12  ;;  %p1425_p4 = scmp.lt.s32.totalorder %s1419_s12, %s1419_s12 }
  0xa9   :  { %v1758_v14 = vld [vmem:[#allocation8 + $0x28] sm:$0xff]   ;;  %v226_v15 = vpack.c.bf16 %v224_v13, %v222_v12  ;;  %v1769_v19 = vld [vmem:[#allocation8 + $0x30] sm:$0xff]   ;;  %v1772_v20 = vld [vmem:[#allocation8 + $0x78] sm:$0xff]  }
  0xaa   :  { %932 = vmatpush3.bf16.msra.mxu0 %v1735_v4  ;;  %v1760_v16 = vld [vmem:[#allocation11] sm:$0xff]   ;;  %v1767_v18 = vld [vmem:[#allocation11 + $0x8] sm:$0xff]   ;;  %v1774_v21 = vld [vmem:[#allocation11 + $0x10] sm:$0xff]   ;;  %p1426_p5 = por %p1425_p4, %p1424_p3 }
  0xab   :  { %933 = vmatprep.subr.bf16.mxu0 %v1738_v5  ;;  %361 = vmatprep.mubr.bf16.mxu0 %v226_v15  ;;  %v1779_v22 = vld [vmem:[#allocation8 + $0x38] sm:$0xff]   ;;  %v221_v23 = vld [vmem:[#allocation2] sm:$0xff]  ;;  %v223_v24 = vld [vmem:[#allocation2 + $0x10] sm:$0xff] }
  0xac   :  { %1050 = vmatpush3.bf16.msra.mxu1 %v1760_v16  ;;  %v1782_v25 = vld [vmem:[#allocation11 + $0x18] sm:$0xff]   ;;  %v225_v26 = vpack.c.bf16 %v223_v24, %v221_v23  ;;  %v1790_v27 = vld [vmem:[#allocation11 + $0x20] sm:$0xff]   ;;  %v1796_v28 = vld [vmem:[#allocation11 + $0x28] sm:$0xff]   ;;  %p1427_p6 = pnand %p1426_p5, %p1420_p2 }
  0xad   :  { %1051 = vmatprep.subr.bf16.mxu1 %v1512_v0  ;;  %v1800_v29 = vld [vmem:[#allocation11 + $0x30] sm:$0xff]   ;;  %v1804_v30 = vld [vmem:[#allocation11 + $0x38] sm:$0xff]   ;;  %v1812_v31 = vld [vmem:[#allocation14] sm:$0xff]  }
  0xae   :  { %934 = vmatpush3.bf16.msra.mxu0 %v1741_v6  ;;  %v1815_v32 = vld [vmem:[#allocation14 + $0x8] sm:$0xff]   ;;  %v1819_v33 = vld [vmem:[#allocation14 + $0x10] sm:$0xff]   ;;  %v1823_v34 = vld [vmem:[#allocation14 + $0x18] sm:$0xff]  }
  0xaf   :  { %935 = vmatprep.subr.bf16.mxu0 %v1744_v7  ;;  %v1827_v35 = vld [vmem:[#allocation14 + $0x20] sm:$0xff]   ;;  %v1831_v36 = vld [vmem:[#allocation14 + $0x28] sm:$0xff]   ;;  %v1836_v38 = vld [vmem:[#allocation10] ss:$0 sm:$0xff] }
  0xb0   :  { %1052 = vmatpush3.bf16.msra.mxu1 %v1767_v18  ;;  %v569_v46 = vld [vmem:[#allocation5 + $0x8] sm:$0xff]  ;;  %v571_v47 = vld [vmem:[#allocation5 + $0x18] sm:$0xff]  ;;  %v568_v52 = vld [vmem:[#allocation5] sm:$0xff] }
  0xb1   :  { %1053 = vmatprep.subr.bf16.mxu1 %v1512_v0  ;;  %v573_v50 = vpack.c.bf16 %v571_v47, %v569_v46  ;;  %v570_v53 = vld [vmem:[#allocation5 + $0x10] sm:$0xff]  ;;  %v1876_v56 = vld [vmem:[#allocation14 + $0x38] sm:$0xff]  }
  0xb2   :  { %936 = vmatpush3.bf16.msra.mxu0 %v1747_v8  ;;  %v572_v54 = vpack.c.bf16 %v570_v53, %v568_v52  ;;  %v1870_v55 = vld [vmem:[#allocation14 + $0x30] sm:$0xff]   ;;  %v1882_v57 = vld [vmem:[#allocation13] ss:$0 sm:$0xff] }
  0xb3   :  { %937 = vmatprep.subr.bf16.mxu0 %v1750_v9 }
  0xb4   :  { %1054 = vmatpush3.bf16.msra.mxu1 %v1774_v21 }
  0xb5   :  { %1055 = vmatprep.subr.bf16.mxu1 %v1512_v0 }
  0xb6   :  { %938 = vmatpush3.bf16.msra.mxu0 %v1753_v10 }
  0xb7   :  { %939 = vmatprep.subr.bf16.mxu0 %v1756_v11 }
  0xb8   :  { %1056 = vmatpush3.bf16.msra.mxu1 %v1782_v25 }
  0xb9   :  { %1057 = vmatprep.subr.bf16.mxu1 %v1512_v0 }
  0xba   :  { %940 = vmatpush3.bf16.msra.mxu0 %v1758_v14 }
  0xbb   :  { %941 = vmatprep.subr.bf16.mxu0 %v1763_v17 }
  0xbc   :  { %1058 = vmatpush3.bf16.msra.mxu1 %v1790_v27 }
  0xbd   :  { %1059 = vmatprep.subr.bf16.mxu1 %v1512_v0 }
  0xbe   :  { %942 = vmatpush3.bf16.msra.mxu0 %v1769_v19 }
  0xbf   :  { %943 = vmatprep.subr.bf16.mxu0 %v1772_v20 }
  0xc0   :  { %1060 = vmatpush3.bf16.msra.mxu1 %v1796_v28 }
  0xc1   :  { %1061 = vmatprep.subr.bf16.mxu1 %v1512_v0 }
  0xc2   :  { %944 = vmatpush3.bf16.msra.mxu0 %v1779_v22 }
  0xc3   :  { %1069 = vmatprep.subr.bf16.mxu0 %v1512_v0 }
  0xc4   :  { %1062 = vmatpush3.bf16.msra.mxu1 %v1800_v29 }
  0xc5   :  { %362 = vmatmul.mubr.bf16.vlgmr.msra.gmra.mrb[0].mxu0 %v225_v26  ;;  %1063 = vmatprep.subr.bf16.mxu1 %v1512_v0 }
  0xc6   :  { %1085 = vmatprep.mubr.msk.bf16.mxu0 %vm1513_vm0, %v1512_v0  ;;  %1070 = vmatpush3.bf16.msra.mxu0 %v1812_v31 }
  0xc7   :  { %1071 = vmatprep.subr.bf16.mxu0 %v1512_v0 }
  0xc8   :  { %1064 = vmatpush3.bf16.msra.mxu1 %v1804_v30 }
  0xc9   :  { %969 = vmatprep.subr.bf16.mxu1 %v1727_v1 }
  0xca   :  { %1072 = vmatpush3.bf16.msra.mxu0 %v1815_v32 }
  0xcb   :  { %1073 = vmatprep.subr.bf16.mxu0 %v1512_v0 }
  0xce   :  { %1074 = vmatpush3.bf16.msra.mxu0 %v1819_v33 }
  0xcf   :  { %1075 = vmatprep.subr.bf16.mxu0 %v1512_v0 }
  0xd2   :  { %1076 = vmatpush3.bf16.msra.mxu0 %v1823_v34 }
  0xd3   :  { %1077 = vmatprep.subr.bf16.mxu0 %v1512_v0 }
  0xd6   :  { %1078 = vmatpush3.bf16.msra.mxu0 %v1827_v35 }
  0xd7   :  { %1079 = vmatprep.subr.bf16.mxu0 %v1512_v0 }
  0xda   :  { %1080 = vmatpush3.bf16.msra.mxu0 %v1831_v36 }
  0xdb   :  { %1081 = vmatprep.subr.bf16.mxu0 %v1512_v0 }
  0xde   :  { %1082 = vmatpush3.bf16.msra.mxu0 %v1870_v55 }
  0xdf   :  { %1083 = vmatprep.subr.bf16.mxu0 %v1512_v0 }
  0xe2   :  { %1084 = vmatpush3.bf16.msra.mxu0 %v1876_v56 }
  0xe3   :  { %1089 = vmatprep.subr.bf16.mxu0 %v1512_v0 }
 0x198   :  { %v945_v37 = vpop.f32.mrb[0].mxu0 }
 0x199   :  { %v946_v39 = vpop.f32.mrb[1].mxu0 }
 0x19a   :  { %v947_v40 = vadd.f32 %v946_v39, %v945_v37  ;;  %v948_v41 = vpop.f32.mrb[2].mxu0 }
 0x19b   :  { %v949_v42 = vpop.f32.mrb[3].mxu0 }
 0x19c   :  { %v364_v43 = vadd.f32 %v947_v40, %v1836_v38  ;;  %v950_v44 = vadd.f32 %v949_v42, %v948_v41 }
 0x19e   :  { %v367_v45 = vadd.f32 %v950_v44, %v1836_v38  ;;  %v370_v48 = vmax.f32 %v364_v43, 0.0  ;;  %v706_v43 = vld [vmem:[#allocation7 + $0x8] sm:$0xff]  ;;  %v708_v44 = vld [vmem:[#allocation7 + $0x18] sm:$0xff] }
 0x19f   :  { %v710_v47 = vpack.c.bf16 %v708_v44, %v706_v43 }
 0x1a0   :  { %v371_v49 = vmax.f32 %v367_v45, 0.0 }
 0x1a2   :  { %v372_v51 = vpack.c.bf16 %v371_v49, %v370_v48 }
 0x1a4   :  { %1066 = vmatmul.mubr.bf16.vlgmr.msra.gmra.mrb[0].mxu1 %v372_v51 }
 0x1a5   :  { %970 = vmatpush3.bf16.msra.mxu1 %v1729_v2  ;;  %606 = vmatprep.mubr.bf16.mxu1 %v573_v50 }
 0x1a6   :  { %971 = vmatprep.subr.bf16.mxu1 %v1732_v3 }
 0x1a9   :  { %972 = vmatpush3.bf16.msra.mxu1 %v1735_v4 }
 0x1aa   :  { %973 = vmatprep.subr.bf16.mxu1 %v1738_v5 }
 0x1ad   :  { %974 = vmatpush3.bf16.msra.mxu1 %v1741_v6 }
 0x1ae   :  { %975 = vmatprep.subr.bf16.mxu1 %v1744_v7 }
 0x1b1   :  { %976 = vmatpush3.bf16.msra.mxu1 %v1747_v8 }
 0x1b2   :  { %977 = vmatprep.subr.bf16.mxu1 %v1750_v9 }
 0x1b5   :  { %978 = vmatpush3.bf16.msra.mxu1 %v1753_v10 }
 0x1b6   :  { %979 = vmatprep.subr.bf16.mxu1 %v1756_v11 }
 0x1b9   :  { %980 = vmatpush3.bf16.msra.mxu1 %v1758_v14 }
 0x1ba   :  { %981 = vmatprep.subr.bf16.mxu1 %v1763_v17 }
 0x1bd   :  { %982 = vmatpush3.bf16.msra.mxu1 %v1769_v19 }
 0x1be   :  { %983 = vmatprep.subr.bf16.mxu1 %v1772_v20 }
 0x1c1   :  { %984 = vmatpush3.bf16.msra.mxu1 %v1779_v22 }
 0x1c2   :  { %1109 = vmatprep.subr.bf16.mxu1 %v1512_v0 }
 0x1c4   :  { %607 = vmatmul.mubr.bf16.vlgmr.msra.gmra.mrb[4].mxu1 %v572_v54 }
 0x1c5   :  { %1110 = vmatpush3.bf16.msra.mxu1 %v1812_v31  ;;  %1125 = vmatprep.mubr.msk.bf16.mxu1 %vm1513_vm0, %v1512_v0 }
 0x1c6   :  { %1111 = vmatprep.subr.bf16.mxu1 %v1512_v0 }
 0x1c9   :  { %1112 = vmatpush3.bf16.msra.mxu1 %v1815_v32 }
 0x1ca   :  { %1113 = vmatprep.subr.bf16.mxu1 %v1512_v0 }
 0x1cd   :  { %1114 = vmatpush3.bf16.msra.mxu1 %v1819_v33 }
 0x1ce   :  { %1115 = vmatprep.subr.bf16.mxu1 %v1512_v0 }
 0x1d1   :  { %1116 = vmatpush3.bf16.msra.mxu1 %v1823_v34 }
 0x1d2   :  { %1117 = vmatprep.subr.bf16.mxu1 %v1512_v0 }
 0x1d5   :  { %1118 = vmatpush3.bf16.msra.mxu1 %v1827_v35 }
 0x1d6   :  { %1119 = vmatprep.subr.bf16.mxu1 %v1512_v0 }
 0x1d9   :  { %1120 = vmatpush3.bf16.msra.mxu1 %v1831_v36 }
 0x1da   :  { %1121 = vmatprep.subr.bf16.mxu1 %v1512_v0 }
 0x1dd   :  { %1122 = vmatpush3.bf16.msra.mxu1 %v1870_v55 }
 0x1de   :  { %1123 = vmatprep.subr.bf16.mxu1 %v1512_v0 }
 0x1e1   :  { %1124 = vmatpush3.bf16.msra.mxu1 %v1876_v56 }
 0x1e2   :  { %1129 = vmatprep.subr.bf16.mxu1 %v1512_v0 }
 0x277   :  { %v461_v58 = vpop.f32.mrb[0].mxu1 }
 0x278   :  { %v462_v59 = vadd.f32 %v1882_v57, %v461_v58  ;;  %v1067_v60 = vpop.f32.mrb[1].mxu1 }
 0x279   :  { %v464_v61 = vpop.f32.mrb[2].mxu1 }
 0x27a   :  { %v465_v62 = vadd.f32 %v1882_v57, %v464_v61  ;;  %v1068_v63 = vpop.f32.mrb[3].mxu1  ;;  %v468_v12 = vmax.f32 %v462_v59, 0.0 }
 0x27c   :  { %v469_v13 = vmax.f32 %v465_v62, 0.0 }
 0x27e   :  { %v470_v15 = vpack.c.bf16 %v469_v13, %v468_v12 }
 0x280   :  { %1086 = vmatmul.mubr.bf16.vlgmr.msra.gmra.mrb[4].mxu0 %v470_v15 }
 0x281   :  { %1090 = vmatpush3.bf16.msra.mxu0 %v1760_v16  ;;  %1105 = vmatprep.mubr.msk.bf16.mxu0 %vm1513_vm0, %v1512_v0 }
 0x282   :  { %1091 = vmatprep.subr.bf16.mxu0 %v1512_v0 }
 0x285   :  { %1092 = vmatpush3.bf16.msra.mxu0 %v1767_v18 }
 0x286   :  { %1093 = vmatprep.subr.bf16.mxu0 %v1512_v0 }
 0x289   :  { %1094 = vmatpush3.bf16.msra.mxu0 %v1774_v21 }
 0x28a   :  { %1095 = vmatprep.subr.bf16.mxu0 %v1512_v0 }
 0x28d   :  { %1096 = vmatpush3.bf16.msra.mxu0 %v1782_v25 }
 0x28e   :  { %1097 = vmatprep.subr.bf16.mxu0 %v1512_v0 }
 0x291   :  { %1098 = vmatpush3.bf16.msra.mxu0 %v1790_v27 }
 0x292   :  { %1099 = vmatprep.subr.bf16.mxu0 %v1512_v0 }
 0x295   :  { %1100 = vmatpush3.bf16.msra.mxu0 %v1796_v28 }
 0x296   :  { %1101 = vmatprep.subr.bf16.mxu0 %v1512_v0 }
 0x297   :  { %v985_v23 = vpop.f32.mrb[4].mxu1 }
 0x298   :  { %v986_v24 = vpop.f32.mrb[5].mxu1 }
 0x299   :  { %v987_v26 = vadd.f32 %v986_v24, %v985_v23  ;;  %v988_v37 = vpop.f32.mrb[6].mxu1  ;;  %1102 = vmatpush3.bf16.msra.mxu0 %v1800_v29 }
 0x29a   :  { %v989_v39 = vpop.f32.mrb[7].mxu1  ;;  %1103 = vmatprep.subr.bf16.mxu0 %v1512_v0 }
 0x29b   :  { %v609_v40 = vadd.f32 %v987_v26, %v1836_v38  ;;  %v990_v41 = vadd.f32 %v989_v39, %v988_v37 }
 0x29d   :  { %v612_v42 = vadd.f32 %v990_v41, %v1836_v38  ;;  %1104 = vmatpush3.bf16.msra.mxu0 %v1804_v30  ;;  %v615_v45 = vmax.f32 %v609_v40, 0.0 }
 0x29e   :  { %1009 = vmatprep.subr.bf16.mxu0 %v1727_v1  ;;  %v705_v1 = vld [vmem:[#allocation7] sm:$0xff] }
 0x29f   :  { %v616_v46 = vmax.f32 %v612_v42, 0.0 }
 0x2a1   :  { %v617_v48 = vpack.c.bf16 %v616_v46, %v615_v45 }
 0x2a3   :  { %1106 = vmatmul.mubr.bf16.vlgmr.msra.gmra.mrb[8].mxu0 %v617_v48 }
 0x2a4   :  { %1010 = vmatpush3.bf16.msra.mxu0 %v1729_v2  ;;  %743 = vmatprep.mubr.bf16.mxu0 %v710_v47  ;;  %v707_v2 = vld [vmem:[#allocation7 + $0x10] sm:$0xff] }
 0x2a5   :  { %1011 = vmatprep.subr.bf16.mxu0 %v1732_v3  ;;  %v709_v3 = vpack.c.bf16 %v707_v2, %v705_v1 }
 0x2a8   :  { %1012 = vmatpush3.bf16.msra.mxu0 %v1735_v4  ;;  %v1939_v4 = vld [vmem:[#allocation16] ss:$0 sm:$0xff] }
 0x2a9   :  { %1013 = vmatprep.subr.bf16.mxu0 %v1738_v5 }
 0x2ac   :  { %1014 = vmatpush3.bf16.msra.mxu0 %v1741_v6 }
 0x2ad   :  { %1015 = vmatprep.subr.bf16.mxu0 %v1744_v7 }
 0x2b0   :  { %1016 = vmatpush3.bf16.msra.mxu0 %v1747_v8 }
 0x2b1   :  { %1017 = vmatprep.subr.bf16.mxu0 %v1750_v9 }
 0x2b4   :  { %1018 = vmatpush3.bf16.msra.mxu0 %v1753_v10 }
 0x2b5   :  { %1019 = vmatprep.subr.bf16.mxu0 %v1756_v11 }
 0x2b8   :  { %1020 = vmatpush3.bf16.msra.mxu0 %v1758_v14 }
 0x2b9   :  { %1021 = vmatprep.subr.bf16.mxu0 %v1763_v17 }
 0x2bc   :  { %1022 = vmatpush3.bf16.msra.mxu0 %v1769_v19 }
 0x2bd   :  { %1023 = vmatprep.subr.bf16.mxu0 %v1772_v20 }
 0x2c0   :  { %1024 = vmatpush3.bf16.msra.mxu0 %v1779_v22 }
 0x2c1   :  { %1149 = vmatprep.subr.bf16.mxu0 %v1512_v0 }
 0x2c3   :  { %744 = vmatmul.mubr.bf16.vlgmr.msra.gmra.mrb[12].mxu0 %v709_v3 }
 0x2c4   :  { %1150 = vmatpush3.bf16.msra.mxu0 %v1812_v31  ;;  %1165 = vmatprep.mubr.msk.bf16.mxu0 %vm1513_vm0, %v1512_v0 }
 0x2c5   :  { %1151 = vmatprep.subr.bf16.mxu0 %v1512_v0 }
 0x2c8   :  { %1152 = vmatpush3.bf16.msra.mxu0 %v1815_v32 }
 0x2c9   :  { %1153 = vmatprep.subr.bf16.mxu0 %v1512_v0 }
 0x2cc   :  { %1154 = vmatpush3.bf16.msra.mxu0 %v1819_v33 }
 0x2cd   :  { %1155 = vmatprep.subr.bf16.mxu0 %v1512_v0 }
 0x2d0   :  { %1156 = vmatpush3.bf16.msra.mxu0 %v1823_v34 }
 0x2d1   :  { %1157 = vmatprep.subr.bf16.mxu0 %v1512_v0 }
 0x2d4   :  { %1158 = vmatpush3.bf16.msra.mxu0 %v1827_v35 }
 0x2d5   :  { %1159 = vmatprep.subr.bf16.mxu0 %v1512_v0 }
 0x2d8   :  { %1160 = vmatpush3.bf16.msra.mxu0 %v1831_v36 }
 0x2d9   :  { %1161 = vmatprep.subr.bf16.mxu0 %v1512_v0 }
 0x2dc   :  { %1162 = vmatpush3.bf16.msra.mxu0 %v1870_v55 }
 0x2dd   :  { %1163 = vmatprep.subr.bf16.mxu0 %v1512_v0 }
 0x2e0   :  { %1164 = vmatpush3.bf16.msra.mxu0 %v1876_v56 }
 0x353   :  { %v559_v5 = vpop.f32.mrb[4].mxu0 }
 0x354   :  { %v560_v6 = vadd.f32 %v1939_v4, %v559_v5  ;;  %v1087_v7 = vpop.f32.mrb[5].mxu0 }
 0x355   :  { %v562_v8 = vpop.f32.mrb[6].mxu0 }
 0x356   :  { %566 = vst [vmem:[#allocation17] sm:$0xff] %v560_v6  ;;  %v563_v9 = vadd.f32 %v1939_v4, %v562_v8  ;;  %v1088_v10 = vpop.f32.mrb[7].mxu0 }
 0x358   :  { %567 = vst [vmem:[#allocation17 + $0x8] sm:$0xff] %v563_v9 }
 0x376   :  { %v652_v11 = vpop.f32.mrb[8].mxu0 }
 0x377   :  { %v653_v14 = vadd.f32 %v1882_v57, %v652_v11  ;;  %v1107_v17 = vpop.f32.mrb[9].mxu0 }
 0x378   :  { %v655_v19 = vpop.f32.mrb[10].mxu0 }
 0x379   :  { %v656_v20 = vadd.f32 %v1882_v57, %v655_v19  ;;  %v1108_v22 = vpop.f32.mrb[11].mxu0  ;;  %v659_v31 = vmax.f32 %v653_v14, 0.0 }
 0x37b   :  { %v660_v32 = vmax.f32 %v656_v20, 0.0 }
 0x37d   :  { %v661_v33 = vpack.c.bf16 %v660_v32, %v659_v31 }
 0x37f   :  { %1126 = vmatmul.mubr.bf16.vlgmr.msra.gmra.mrb[8].mxu1 %v661_v33 }
 0x380   :  { %1130 = vmatpush3.bf16.msra.mxu1 %v1760_v16  ;;  %1145 = vmatprep.mubr.msk.bf16.mxu1 %vm1513_vm0, %v1512_v0 }
 0x381   :  { %1131 = vmatprep.subr.bf16.mxu1 %v1512_v0 }
 0x384   :  { %1132 = vmatpush3.bf16.msra.mxu1 %v1767_v18 }
 0x385   :  { %1133 = vmatprep.subr.bf16.mxu1 %v1512_v0 }
 0x388   :  { %1134 = vmatpush3.bf16.msra.mxu1 %v1774_v21 }
 0x389   :  { %1135 = vmatprep.subr.bf16.mxu1 %v1512_v0 }
 0x38c   :  { %1136 = vmatpush3.bf16.msra.mxu1 %v1782_v25 }
 0x38d   :  { %1137 = vmatprep.subr.bf16.mxu1 %v1512_v0 }
 0x390   :  { %1138 = vmatpush3.bf16.msra.mxu1 %v1790_v27 }
 0x391   :  { %1139 = vmatprep.subr.bf16.mxu1 %v1512_v0 }
 0x394   :  { %1140 = vmatpush3.bf16.msra.mxu1 %v1796_v28 }
 0x395   :  { %1141 = vmatprep.subr.bf16.mxu1 %v1512_v0 }
 0x396   :  { %v1025_v16 = vpop.f32.mrb[12].mxu0 }
 0x397   :  { %v1026_v18 = vpop.f32.mrb[13].mxu0 }
 0x398   :  { %v1027_v34 = vadd.f32 %v1026_v18, %v1025_v16  ;;  %v1028_v35 = vpop.f32.mrb[14].mxu0  ;;  %1142 = vmatpush3.bf16.msra.mxu1 %v1800_v29 }
 0x399   :  { %v1029_v21 = vpop.f32.mrb[15].mxu0  ;;  %1143 = vmatprep.subr.bf16.mxu1 %v1512_v0 }
 0x39a   :  { %v746_v25 = vadd.f32 %v1027_v34, %v1836_v38  ;;  %v1030_v36 = vadd.f32 %v1029_v21, %v1028_v35 }
 0x39c   :  { %v749_v27 = vadd.f32 %v1030_v36, %v1836_v38  ;;  %1144 = vmatpush3.bf16.msra.mxu1 %v1804_v30  ;;  %v752_v49 = vmax.f32 %v746_v25, 0.0 }
 0x39e   :  { %v753_v28 = vmax.f32 %v749_v27, 0.0 }
 0x3a0   :  { %v754_v50 = vpack.c.bf16 %v753_v28, %v752_v49 }
 0x3a2   :  { %1146 = vmatmul.mubr.bf16.vlgmr.msra.gmra.mrb[12].mxu1 %v754_v50 }
 0x452   :  { %v696_v51 = vpop.f32.mrb[8].mxu1 }
 0x453   :  { %v697_v52 = vadd.f32 %v1939_v4, %v696_v51  ;;  %v1127_v53 = vpop.f32.mrb[9].mxu1 }
 0x454   :  { %v699_v54 = vpop.f32.mrb[10].mxu1 }
 0x455   :  { %703 = vst [vmem:[#allocation18] sm:$0xff] %v697_v52  ;;  %v700_v29 = vadd.f32 %v1939_v4, %v699_v54  ;;  %v1128_v0 = vpop.f32.mrb[11].mxu1 }
 0x457   :  { %704 = vst [vmem:[#allocation18 + $0x8] sm:$0xff] %v700_v29 }
 0x475   :  { %v789_v55 = vpop.f32.mrb[12].mxu1 }
 0x476   :  { %v790_v56 = vadd.f32 %v1882_v57, %v789_v55  ;;  %v1147_v38 = vpop.f32.mrb[13].mxu1 }
 0x477   :  { %v792_v58 = vpop.f32.mrb[14].mxu1 }
 0x478   :  { %v793_v30 = vadd.f32 %v1882_v57, %v792_v58  ;;  %v1148_v59 = vpop.f32.mrb[15].mxu1  ;;  %v796_v60 = vmax.f32 %v790_v56, 0.0 }
 0x47a   :  { %v797_v61 = vmax.f32 %v793_v30, 0.0 }
 0x47c   :  { %v798_v62 = vpack.c.bf16 %v797_v61, %v796_v60 }
 0x47e   :  { %1166 = vmatmul.mubr.bf16.vlgmr.msra.gmra.mrb[16].mxu0 %v798_v62 }
 0x47f   :  { %1430 = shalt.err (!%p1427_p6)
}
 0x480   :  { %s1431_s14 = scalar_lea.hbm %s2025_s10, 256 }
 0x481   :  { %p1432_p7 = scmp.ne.s32.totalorder %s2025_s10, %s1431_s14  ;;  %p1435_p8 = scmp.lt.u32.totalorder %s1431_s14, %s2025_s10 }
 0x483   :  { %p1437_p9 = pnand %p1435_p8, %p1432_p7 }
 0x485   :  { %1440 = shalt.err (!%p1437_p9)
}
 0x486   :  { %s1516_s0 = smov 128   ;;  %s1517_s4 = smov 8  }
 0x487   :  { %865 = dma.vmem_to_hbm [thread:$0]  %s860_s29, 256, %s2025_s10, [#allocation19], %s1516_s0, %s1516_s0, %s1517_s4  }
 0x488   :  { %s1441_s3 = scalar_lea.vmem %s848_s21, 256  ;;  %p1446_p11 = scmp.lt.s32.totalorder %s848_s21, %s848_s21 }
 0x489   :  { %p1442_p10 = scmp.ne.s32.totalorder %s848_s21, %s1441_s3  ;;  %p1447_p12 = scmp.lt.s32.totalorder %s1441_s3, %s1441_s3 }
 0x48b   :  { %p1448_p13 = por %p1447_p12, %p1446_p11 }
 0x48d   :  { %p1449_p0 = pnand %p1448_p13, %p1442_p10 }
 0x48f   :  { %1452 = shalt.err (!%p1449_p0)
}
 0x490   :  { %s1453_s24 = scalar_lea.hbm %s2024_s9, 256 }
 0x491   :  { %p1454_p1 = scmp.ne.s32.totalorder %s2024_s9, %s1453_s24  ;;  %p1457_p2 = scmp.lt.u32.totalorder %s1453_s24, %s2024_s9 }
 0x493   :  { %p1459_p3 = pnand %p1457_p2, %p1454_p1 }
 0x495   :  { %1462 = shalt.err (!%p1459_p3)
}
 0x496   :  { %853 = dma.vmem_to_hbm [thread:$0]  %s848_s21, 256, %s2024_s9, [#allocation4], %s1516_s0, %s1516_s0, %s1517_s4  }
 0x497   :  { %s1518_s6 = smov [#allocation20]  }
 0x498   :  { %s871_s22 = sshll.u32 %s1518_s6, 4  ;;  %s872_s22 = int_to_ptr.vmem [resolvable:$true] %s871_s22 }
 0x499   :  { %s1463_s2 = scalar_lea.vmem %s872_s22, 256  ;;  %p1468_p5 = scmp.lt.s32.totalorder %s872_s22, %s872_s22 }
 0x49a   :  { %p1464_p4 = scmp.ne.s32.totalorder %s872_s22, %s1463_s2  ;;  %p1469_p6 = scmp.lt.s32.totalorder %s1463_s2, %s1463_s2 }
 0x49c   :  { %p1470_p7 = por %p1469_p6, %p1468_p5 }
 0x49e   :  { %p1471_p8 = pnand %p1470_p7, %p1464_p4 }
 0x551   :  { %v833_v57 = vpop.f32.mrb[16].mxu0 }
 0x552   :  { %v834_v63 = vadd.f32 %v1939_v4, %v833_v57  ;;  %v1167_v12 = vpop.f32.mrb[17].mxu0 }
 0x553   :  { %v836_v13 = vpop.f32.mrb[18].mxu0 }
 0x554   :  { %840 = vst [vmem:[#allocation20] sm:$0xff] %v834_v63  ;;  %v837_v15 = vadd.f32 %v1939_v4, %v836_v13  ;;  %v1168_v23 = vpop.f32.mrb[19].mxu0 }
 0x556   :  { %841 = vst [vmem:[#allocation20 + $0x8] sm:$0xff] %v837_v15 }
 0x557   :  { %1474 = shalt.err (!%p1471_p8)
}
 0x558   :  { %s1475_s29 = scalar_lea.hbm %s2026_s11, 256 }
 0x559   :  { %p1476_p9 = scmp.ne.s32.totalorder %s2026_s11, %s1475_s29  ;;  %p1479_p10 = scmp.lt.u32.totalorder %s1475_s29, %s2026_s11 }
 0x55b   :  { %p1481_p11 = pnand %p1479_p10, %p1476_p9 }
 0x55d   :  { %1484 = shalt.err (!%p1481_p11)
}
 0x55e   :  { %877 = dma.vmem_to_hbm [thread:$0]  %s872_s22, 256, %s2026_s11, [#allocation19], %s1516_s0, %s1516_s0, %s1517_s4  }
 0x55f   :  { %1495 = dma.done.wait [#allocation4], 256  }
 0x560   :  { %1496 = vsyncadd [#allocation4], 4294967040 }
 0x561   :  { %1497 = dma.done.wait [#allocation19], 512  }
 0x562   :  { %1498 = vsyncadd [#allocation19], 4294966784 }
 0x563   :  { %887 = vsyncpa [#allocation3], 1 }
 0x564   :  { %888 = vsyncpa [#allocation6], 1 }
 0x565   :  { %889 = vsyncpa [#allocation9], 1 }
 0x566   :  { %890 = vsyncpa [#allocation12], 1 }
 0x567   :  { %891 = vsyncpa [#allocation15], 1 }
 0x568   :  { %892 = vsyncpa [#allocation4], 1 }
 0x569   :  { %893 = vsyncpa [#allocation19], 1 }

</bundles_post_ra>
